<compile_context>
chip_gen: v5e
topology: v5e:2x2
jax: 0.10.0
libtpu: 0.0.40
codegen_flags: <defaults>
</compile_context>

<pallas_src>
import math
from typing import NamedTuple

import jax
import jax.numpy as jnp
from jax.experimental import pallas as pl
from jax.experimental.pallas import tpu as pltpu


def _location_kernel(p_ref, w_ref, o_ref):
    # p_ref: (R, G*CK)   bf16 packed patch rows
    # w_ref: (G*CK, G*A) bf16 block-diagonal fused conv+dense weight
    # o_ref: (R, G*A)    f32 lane-dense output tile (unmasked vst)
    o_ref[...] = jnp.dot(p_ref[...], w_ref[...],
                         preferred_element_type=jnp.float32)


class LocationParams(NamedTuple):
    w_bd: jax.Array      # (G*CK, G*A) bf16 block-diagonal fused weight
    w_fused: jax.Array   # (CK, A) f32 fused weight (toy-shape XLA fallback)
    G: int               # rows packed per MXU pass
    K: int               # conv kernel size
    C: int               # conv input channels (= 2)
    A: int               # attention_dim (output features)


def _pick_group(A, CK, max_weight_bytes=2 << 20):
    # Smallest G making G*A a multiple of 128 (lane-dense, unmasked stores)...
    g = 128 // math.gcd(A, 128)
    # ...then widen to 256 output lanes (full 256-wide MXU on v6e/v7x) while
    # the block-diagonal weight stays tiny.
    if (g * A) % 256 != 0 and (2 * g * CK) * (2 * g * A) * 2 <= max_weight_bytes:
        g *= 2
    return g


def prepare_location_params(w_conv, w_dense):
    """One-time weight fusion (hoisted out of the per-call path).

    w_conv: (F, C, K) PyTorch Conv1d weight; w_dense: (A, F) PyTorch Linear."""
    F_out, C, K = w_conv.shape
    A = w_dense.shape[0]
    CK = C * K
    # wconv_mat[k*C + c, f] = w_conv[f, c, k]   (matches im2col tap ordering)
    wconv_mat = jnp.transpose(w_conv, (2, 1, 0)).reshape(CK, F_out)
    w_fused = jnp.dot(wconv_mat.astype(jnp.float32),
                      w_dense.T.astype(jnp.float32))            # (CK, A) f32
    G = _pick_group(A, CK)
    eye = jnp.eye(G, dtype=jnp.float32)
    w_bd = (eye[:, None, :, None] * w_fused[None, :, None, :]
            ).reshape(G * CK, G * A).astype(jnp.bfloat16)
    return LocationParams(w_bd=w_bd, w_fused=w_fused, G=G, K=K, C=C, A=A)


def _pick_row_tile(rows_g, *, max_tile=1024, target_steps=16):
    # Keep >= ~target_steps grid steps (v7x shards the "parallel" axis across
    # its 2 TensorCores) while amortizing per-step overhead with big tiles.
    r = min(max_tile, pl.cdiv(rows_g, target_steps))
    return max(8, ((r + 7) // 8) * 8)


def location_layer_forward(x, params, *, row_tile=1024, allow_xla_fallback=False):
    """x: (B, 2, T) float32 -> (B, T, A) float32 (PyTorch location_layer.forward)."""
    B, C, T = x.shape
    assert C == params.C
    K, A, G = params.K, params.A, params.G
    CK = C * K
    pad = (K - 1) // 2

    # --- im2col, built time-major and in bf16 (only x itself is transposed,
    # never the K-times-inflated patch slab) ---
    x_t = jnp.transpose(x, (0, 2, 1)).astype(jnp.bfloat16)      # (B, T, C) bf16
    x_tp = jnp.pad(x_t, ((0, 0), (pad, pad), (0, 0)))           # (B, T+2p, C)
    # tap-major, channel-minor: patches[b, t, k*C + c] = x_tp[b, t + k, c]
    patches = jnp.concatenate(
        [x_tp[:, k:k + T, :] for k in range(K)], axis=-1)       # (B, T, CK)

    rows = B * T
    p_flat = patches.reshape(rows, CK)                          # bf16

    rows_g = pl.cdiv(rows, G)                                   # grouped rows
    R = _pick_row_tile(rows_g, max_tile=row_tile)
    num_steps = pl.cdiv(rows_g, R)

    if allow_xla_fallback and num_steps <= 2:
        # Toy shapes: a 1-2 step grid has no pipelining and pays the full
        # pallas_call fixed cost; XLA's fused matmul wins here.
        out = jnp.dot(p_flat, params.w_fused.astype(jnp.bfloat16),
                      preferred_element_type=jnp.float32)
        return out.reshape(B, T, A)

    rows_g_pad = num_steps * R
    rows_total = rows_g_pad * G
    if rows_total != rows:
        p_flat = jnp.pad(p_flat, ((0, rows_total - rows), (0, 0)))
    p_packed = p_flat.reshape(rows_g_pad, G * CK)               # free reshape

    out_packed = pl.pallas_call(
        _location_kernel,
        out_shape=jax.ShapeDtypeStruct((rows_g_pad, G * A), jnp.float32),
        grid_spec=pltpu.PrefetchScalarGridSpec(
            num_scalar_prefetch=0,
            grid=(num_steps,),
            in_specs=[
                pl.BlockSpec((R, G * CK), lambda i: (i, 0)),
                pl.BlockSpec((G * CK, G * A), lambda i: (0, 0)),
            ],
            out_specs=pl.BlockSpec((R, G * A), lambda i: (i, 0)),
        ),
        compiler_params=pltpu.CompilerParams(
            dimension_semantics=("parallel",)),
    )(p_packed, params.w_bd)

    out = out_packed.reshape(rows_total, A)                     # free reshape
    if rows_total != rows:
        out = out[:rows]
    return out.reshape(B, T, A)


def _xavier_uniform(key, shape, fan_in, fan_out, gain):
    bound = gain * math.sqrt(6.0 / (fan_in + fan_out))
    return jax.random.uniform(key, shape, jnp.float32, -bound, bound)


def _reference(x, w_conv, w_dense):
    # pure-JAX f32 reference with PyTorch Conv1d/Linear semantics
    K = w_conv.shape[-1]
    pad = (K - 1) // 2
    x_pad = jnp.pad(x, ((0, 0), (0, 0), (pad, pad)))
    conv = jax.lax.conv_general_dilated(
        x_pad, w_conv, window_strides=(1,), padding="VALID",
        dimension_numbers=("NCH", "OIH", "NCH"))                # (B, F, T)
    return jnp.einsum("bft,af->bta", conv, w_dense)             # (B, T, A)


if __name__ == "__main__":
    key = jax.random.PRNGKey(0)

    # (B, T, n_filters, kernel_size, attention_dim) -- small, module-consistent
    configs = [
        (2, 16, 8, 5, 16),     # tiny: single grid step, G=16 (G*A = 256 lanes)
        (2, 160, 8, 5, 32),    # small: 5-step grid,     G=8  (G*A = 256 lanes)
    ]
    for (B, T, n_filt, ksize, attn_dim) in configs:
        key, k_x, k_conv, k_dense = jax.random.split(key, 4)
        # attention_weights_cat: (B, 2, T)
        x = jax.random.normal(k_x, (B, 2, T), jnp.float32)
        # Conv1d weight (F, 2, K): xavier_uniform, gain('linear') = 1.0
        w_conv = _xavier_uniform(k_conv, (n_filt, 2, ksize),
                                 fan_in=2 * ksize, fan_out=n_filt * ksize,
                                 gain=1.0)
        # Linear weight (A, F): xavier_uniform, gain('tanh') = 5/3
        w_dense = _xavier_uniform(k_dense, (attn_dim, n_filt),
                                  fan_in=n_filt, fan_out=attn_dim,
                                  gain=5.0 / 3.0)

        params = prepare_location_params(w_conv, w_dense)   # one-time fusion
        fwd = jax.jit(lambda inp, p=params: location_layer_forward(inp, p))
        out = jax.block_until_ready(fwd(x))

        ref = _reference(x, w_conv, w_dense)
        assert out.shape == (B, T, attn_dim)
        # Tolerance covers bf16 patches + bf16-quantized fused weight with
        # f32 MXU accumulation.
        assert jnp.allclose(out, ref, atol=5e-2, rtol=5e-2), (
            float(jnp.max(jnp.abs(out - ref))))

    print("KERNEL_OK")
</pallas_src>

<mosaic_0001>
module attributes {stable_mosaic.version = 11 : i64} {
  func.func @_location_kernel(%arg0: i32, %arg1: memref<8x160xbf16, #tpu.memory_space<vmem>>, %arg2: memref<160x256xbf16, #tpu.memory_space<vmem>>, %arg3: memref<8x256xf32, #tpu.memory_space<vmem>>) attributes {dimension_semantics = [#tpu.dimension_semantics<parallel>], iteration_bounds = array<i64: 1>, scalar_prefetch = 0 : i64, scratch_operands = 0 : i64, tpu.core_type = #tpu.core_type<tc>, window_params = [{transform_indices = @transform_0, window_bounds = array<i64: 8, 160>}, {pipeline_mode = #tpu.pipeline_mode<synchronous>, transform_indices = @transform_1, window_bounds = array<i64: 160, 256>}, {transform_indices = @transform_2, window_bounds = array<i64: 8, 256>}]} {
    %c0 = arith.constant 0 : index
    %c0_0 = arith.constant 0 : index
    %0 = vector.load %arg1[%c0, %c0_0] : memref<8x160xbf16, #tpu.memory_space<vmem>>, vector<8x160xbf16>
    %c0_1 = arith.constant 0 : index
    %c0_2 = arith.constant 0 : index
    %1 = vector.load %arg2[%c0_1, %c0_2] : memref<160x256xbf16, #tpu.memory_space<vmem>>, vector<160x256xbf16>
    %cst = arith.constant dense<0.000000e+00> : vector<8x256xf32>
    %2 = tpu.matmul %0, %1, %cst {dimension_numbers = #tpu.dot_dimension_numbers<[1], [0], [0], [1], [0, 0, 1, 1], [], []>} : vector<8x160xbf16>, vector<160x256xbf16>, vector<8x256xf32> -> vector<8x256xf32>
    %c0_3 = arith.constant 0 : index
    %c0_4 = arith.constant 0 : index
    %3 = vector.load %arg3[%c0_3, %c0_4] : memref<8x256xf32, #tpu.memory_space<vmem>>, vector<8x256xf32>
    tpu.vector_store %arg3[%c0_3, %c0_4], %2 {strides = array<i32>} : memref<8x256xf32, #tpu.memory_space<vmem>>, vector<8x256xf32>,
    return
  }
  func.func @transform_0(%arg0: i32) -> (i32, i32) {
    %c0_i32 = arith.constant 0 : i32
    %c0_i32_0 = arith.constant 0 : i32
    return %arg0, %c0_i32 : i32, i32
  }
  func.func @transform_1(%arg0: i32) -> (i32, i32) {
    %c0_i32 = arith.constant 0 : i32
    %c0_i32_0 = arith.constant 0 : i32
    %c0_i32_1 = arith.constant 0 : i32
    return %c0_i32, %c0_i32_0 : i32, i32
  }
  func.func @transform_2(%arg0: i32) -> (i32, i32) {
    %c0_i32 = arith.constant 0 : i32
    %c0_i32_0 = arith.constant 0 : i32
    return %arg0, %c0_i32 : i32, i32
  }
}

</mosaic_0001>

<bundles_post_ra>
// kernel: _lambda_.1
= control target key start
LH: loop header
LB: loop body
LE: loop exit
PB: predicated region body
PF: predicated region fallthrough
CT: control target
= control target key end

     0   :  { %vm139_vm0 = vcmask 261120   ;;  %s447_s1 = inlined_call_operand.vmem [shape: bf16[160,256], index: 1, kind: input, shape index: {}]   ;;  %s448_s0 = inlined_call_operand.vmem [shape: bf16[8,160], index: 0, kind: input, shape index: {}]   ;;  %s449_s2 = inlined_call_operand.vmem [shape: f32[8,256], index: 2, kind: output, shape index: {}]  }
   0x1   :  { %v259_v0 = vld [vmem:[%s447_s1 + $0x70] sm:$0xf]  ;;  %v298_v1 = vld [vmem:[%s447_s1 + $0x74] sm:$0xf0]  ;;  %v297_v2 = vld [vmem:[%s447_s1 + $0x74] sm:$0xf] }
   0x2   :  { %v260_v3 = vor.u32 %v298_v1, %v259_v0  ;;  %v261_v4 = vld [vmem:[%s447_s1 + $0x78] sm:$0xf0]  ;;  %v251_v5 = vld [vmem:[%s447_s1 + $0x60] sm:$0xf]  ;;  %v296_v6 = vld [vmem:[%s447_s1 + $0x64] sm:$0xf0] }
   0x3   :  { %v264_v7 = vor.u32 %v297_v2, %v261_v4  ;;  %v295_v8 = vld [vmem:[%s447_s1 + $0x64] sm:$0xf]  ;;  %v253_v9 = vld [vmem:[%s447_s1 + $0x68] sm:$0xf0]  ;;  %v252_v10 = vor.u32 %v296_v6, %v251_v5  ;;  %v243_v12 = vld [vmem:[%s447_s1 + $0x50] sm:$0xf] }
   0x4   :  { %143 = vmatpush.bf16.msra.mxu0 %v260_v3  ;;  %v256_v11 = vor.u32 %v295_v8, %v253_v9  ;;  %v294_v13 = vld [vmem:[%s447_s1 + $0x54] sm:$0xf0]  ;;  %v293_v14 = vld [vmem:[%s447_s1 + $0x54] sm:$0xf]  ;;  %v245_v15 = vld [vmem:[%s447_s1 + $0x58] sm:$0xf0] }
   0x5   :  { %169 = vmatpush.bf16.msra.mxu2 %v264_v7  ;;  %v301_v16 = vld [vmem:[%s447_s1 + $0x94] sm:$0xf]  ;;  %v244_v17 = vor.u32 %v294_v13, %v243_v12  ;;  %v235_v18 = vld [vmem:[%s447_s1 + $0x40] sm:$0xf]  ;;  %v292_v19 = vld [vmem:[%s447_s1 + $0x44] sm:$0xf0]  ;;  %v248_v21 = vor.u32 %v293_v14, %v245_v15 }
   0x6   :  { %v277_v20 = vld [vmem:[%s447_s1 + $0x98] sm:$0xf0]  ;;  %v291_v22 = vld [vmem:[%s447_s1 + $0x44] sm:$0xf]  ;;  %v237_v23 = vld [vmem:[%s447_s1 + $0x48] sm:$0xf0]  ;;  %v236_v32 = vor.u32 %v292_v19, %v235_v18 }
   0x7   :  { %v280_v24 = vor.u32 %v301_v16, %v277_v20  ;;  %v299_v25 = vld [vmem:[%s447_s1 + $0x84] sm:$0xf]  ;;  %v269_v26 = vld [vmem:[%s447_s1 + $0x88] sm:$0xf0]  ;;  %v275_v27 = vld [vmem:[%s447_s1 + $0x90] sm:$0xf]  ;;  %v240_v35 = vor.u32 %v291_v22, %v237_v23 }
   0x8   :  { %144 = vmatpush.bf16.msra.mxu0 %v252_v10  ;;  %v302_v28 = vld [vmem:[%s447_s1 + $0x94] sm:$0xf0]  ;;  %v272_v29 = vor.u32 %v299_v25, %v269_v26  ;;  %v12_v31 = vld [vmem:[%s448_s0] sm:$0xff]  ;;  %v227_v36 = vld [vmem:[%s447_s1 + $0x30] sm:$0xf] }
   0x9   :  { %170 = vmatpush.bf16.msra.mxu2 %v256_v11  ;;  %188 = vmatpush.bf16.msra.mxu3 %v280_v24  ;;  %v276_v30 = vor.u32 %v302_v28, %v275_v27  ;;  %v35_v33 = vunpack.c.h.b16 %v12_v31  ;;  %v267_v34 = vld [vmem:[%s447_s1 + $0x80] sm:$0xf]  ;;  %v290_v37 = vld [vmem:[%s447_s1 + $0x34] sm:$0xf0]  ;;  %v300_v38 = vld [vmem:[%s447_s1 + $0x84] sm:$0xf0]  ;;  %v34_v61 = vunpack.c.l.b16 %v12_v31 }
   0xa   :  { %v289_v39 = vld [vmem:[%s447_s1 + $0x34] sm:$0xf]  ;;  %v229_v40 = vld [vmem:[%s447_s1 + $0x38] sm:$0xf0]  ;;  %v268_v42 = vor.u32 %v300_v38, %v267_v34  ;;  %v228_v43 = vor.u32 %v290_v37, %v227_v36  ;;  %v219_v45 = vld [vmem:[%s447_s1 + $0x20] sm:$0xf] }
   0xb   :  { %162 = vmatpush.bf16.msra.mxu1 %v276_v30  ;;  %v37_v41 = vpack.c.b16 %v35_v33, %v35_v33  ;;  %v232_v44 = vor.u32 %v289_v39, %v229_v40  ;;  %v288_v46 = vld [vmem:[%s447_s1 + $0x24] sm:$0xf0]  ;;  %v287_v47 = vld [vmem:[%s447_s1 + $0x24] sm:$0xf]  ;;  %v221_v48 = vld [vmem:[%s447_s1 + $0x28] sm:$0xf0]  ;;  %v36_v0 = vpack.c.b16 %v34_v61, %v34_v61 }
   0xc   :  { %145 = vmatpush.bf16.msra.mxu0 %v244_v17  ;;  %v220_v49 = vor.u32 %v288_v46, %v219_v45  ;;  %v224_v50 = vor.u32 %v287_v47, %v221_v48  ;;  %v211_v51 = vld [vmem:[%s447_s1 + $0x10] sm:$0xf]  ;;  %v286_v52 = vld [vmem:[%s447_s1 + $0x14] sm:$0xf0]  ;;  %v285_v53 = vld [vmem:[%s447_s1 + $0x14] sm:$0xf] }
   0xd   :  { %171 = vmatpush.bf16.msra.mxu2 %v248_v21  ;;  %189 = vmatpush.bf16.msra.mxu3 %v272_v29  ;;  %v213_v54 = vld [vmem:[%s447_s1 + $0x18] sm:$0xf0]  ;;  %v212_v55 = vor.u32 %v286_v52, %v211_v51  ;;  %v203_v57 = vld [vmem:[%s447_s1] sm:$0xf]  ;;  %v284_v58 = vld [vmem:[%s447_s1 + $0x4] sm:$0xf0] }
   0xe   :  { %v216_v56 = vor.u32 %v285_v53, %v213_v54  ;;  %v283_v59 = vld [vmem:[%s447_s1 + $0x4] sm:$0xf]  ;;  %v205_v60 = vld [vmem:[%s447_s1 + $0x8] sm:$0xf0]  ;;  %v204_v62 = vor.u32 %v284_v58, %v203_v57 }
   0xf   :  { %163 = vmatpush.bf16.msra.mxu1 %v268_v42  ;;  %v208_v63 = vor.u32 %v283_v59, %v205_v60 }
  0x10   :  { %146 = vmatpush.bf16.msra.mxu0 %v236_v32  ;;  %282 = vmatmul.msk.bf16.vlgmr.msra.gmra.mxu3 %vm139_vm0, %v37_v41 }
  0x11   :  { %172 = vmatpush.bf16.msra.mxu2 %v240_v35 }
  0x12   :  { %281 = vmatmul.msk.bf16.vlgmr.msra.gmra.mxu1 %vm139_vm0, %v37_v41 }
  0x14   :  { %147 = vmatpush.bf16.msra.mxu0 %v228_v43 }
  0x15   :  { %173 = vmatpush.bf16.msra.mxu2 %v232_v44 }
  0x18   :  { %148 = vmatpush.bf16.msra.mxu0 %v220_v49 }
  0x19   :  { %174 = vmatpush.bf16.msra.mxu2 %v224_v50 }
  0x1c   :  { %149 = vmatpush.bf16.msra.mxu0 %v212_v55 }
  0x1d   :  { %175 = vmatpush.bf16.msra.mxu2 %v216_v56 }
  0x20   :  { %150 = vmatpush.bf16.msra.mxu0 %v204_v62 }
  0x21   :  { %176 = vmatpush.bf16.msra.mxu2 %v208_v63 }
  0x23   :  { %151 = vmatmul.bf16.vlgmr.msra.gmra.mxu0 %v36_v0 }
  0x24   :  { %177 = vmatmul.bf16.vlgmr.msra.gmra.mxu2 %v36_v0 }
  0x8f   :  { %v165_v1 = vpop.f32.mrf.mxu1 }
  0x93   :  { %v191_v2 = vpop.f32.mrf.mxu3 }
  0x97   :  { %v167_v3 = vpop.f32.mrf.mxu1 }
  0x9b   :  { %v193_v4 = vpop.f32.mrf.mxu3 }
  0xa0   :  { %v152_v5 = vpop.f32.mrf.mxu0 }
  0xa1   :  { %v166_v6 = vadd.f32 %v165_v1, %v152_v5 }
  0xa3   :  { %195 = vst [vmem:[%s449_s2] sm:$0xff] %v166_v6 }
  0xa7   :  { %v178_v7 = vpop.f32.mrf.mxu2 }
  0xa8   :  { %v192_v8 = vadd.f32 %v191_v2, %v178_v7  ;;  %v154_v9 = vpop.f32.mrf.mxu0 }
  0xaa   :  { %196 = vst [vmem:[%s449_s2 + $0x8] sm:$0xff] %v192_v8 }
  0xaf   :  { %v180_v10 = vpop.f32.mrf.mxu2 }

</bundles_post_ra>
